<compile_context>
chip_gen: v7x
topology: tpu7x:2x2x1
jax: 0.10.0
libtpu: 0.0.40
codegen_flags: <defaults>
</compile_context>

<pallas_src>
import numpy as np
import jax
import jax.numpy as jnp
from jax.experimental import pallas as pl
from jax.experimental.pallas import tpu as pltpu

# ---- static problem sizes (obs_space['image'] = (7, 7, 3), 7 discrete actions) ----
H = 7
W = 7
B = 2
CIN = 3
N_ACTIONS = 7
EMB = ((H - 1) // 2 - 2) * ((W - 1) // 2 - 2) * 64   # image_embedding_size == 64
MEMORY_SIZE = 2 * EMB                                # semi_memory_size * 2 (passthrough)

C1, C2, C3 = 16, 32, 64                              # conv channel widths

N_TAPS = 4                                           # 2x2 max-pool window positions
PATCH_LANES = 4 * 4 * 4 * CIN                        # 192 lanes per pool tap
MAX_TILE = 256                                       # batch rows per grid step when scaled

# ---- packed bf16 parameter slab layout: (456, 256) ----
P_LANES = 256
R_W1, N_W1 = 0, 192        # kron(I16, W1m)            lanes   0..255
R_W2, N_W2 = 192, 256      # kron(I4,  W2m)            lanes   0..127
R_W3, N_W3 = 192, 128      # W3m (128,64)              lanes 128..191
R_WH2, N_WH2 = 192, 128    # compact head-2 (128,64)   lanes 192..255 (only 8 lanes nonzero)
R_WH1, N_WH1 = 320, 64     # [Wa1|Wc1] (64,128)        lanes 128..255
R_B1 = 448                 # tile(b1,16)               lanes   0..255
R_B23 = 450                # tile(b2,4) | b3           lanes 0..127 | 128..191
R_BH1 = 452                # [ba1|bc1]                 lanes   0..127
R_BH2 = 454                # [ba2|bc2]                 lanes   0..63
P_ROWS = 456


def _conv1_patch_indices():
    """Static (row, col) gather indices for the host-side conv1 im2col.

    Patch lane layout (within one pool tap k): lane = ((t3*4 + t2)*4 + t1)*3 + cin,
    where t3 = conv3 tap, t2 = conv2 tap, t1 = conv1 tap.
    """
    I = np.zeros((N_TAPS, 64), np.int32)
    J = np.zeros((N_TAPS, 64), np.int32)
    g = 0
    for t3 in range(4):
        d3i, d3j = divmod(t3, 2)
        for t2 in range(4):
            d2i, d2j = divmod(t2, 2)
            pi, pj = d3i + d2i, d3j + d2j          # pooled-grid position (0..2)
            for t1 in range(4):
                d1i, d1j = divmod(t1, 2)
                for k in range(N_TAPS):
                    ki, kj = divmod(k, 2)
                    I[k, g] = 2 * pi + ki + d1i    # conv1 input row (<= 6)
                    J[k, g] = 2 * pj + kj + d1j    # conv1 input col (<= 6)
                g += 1
    return I, J


_PATCH_I, _PATCH_J = _conv1_patch_indices()


def _acmodel_kernel(patch_ref, p_ref, out_ref):
    """patch_ref: (T, 768) bf16 conv1 im2col (lanes = pool_tap*192 + feature);
    p_ref: (456, 256) bf16 packed params; out_ref: (T, 64) f32 ->
    lanes 0..6 log-softmax logits, lane 7 value, lanes 8..63 = 0."""
    f32 = jnp.float32
    bf16 = jnp.bfloat16

    # conv1 + ReLU per pool tap, fused MaxPool2d(2,2): 4 dots + elementwise max.
    w1 = p_ref[R_W1:R_W1 + N_W1, :]                                   # (192, 256) bf16
    b1 = p_ref[R_B1:R_B1 + 1, :].astype(f32)                          # (1, 256)
    pooled = None
    for k in range(N_TAPS):
        xk = patch_ref[:, PATCH_LANES * k:PATCH_LANES * (k + 1)]      # (T, 192) bf16
        ck = jnp.maximum(jnp.dot(xk, w1, preferred_element_type=f32) + b1, 0.0)
        pooled = ck if pooled is None else jnp.maximum(pooled, ck)    # (T, 256) f32

    # conv2 + ReLU: pooled activations are already the conv2 im2col patch.
    w2 = p_ref[R_W2:R_W2 + N_W2, 0:128]                               # (256, 128) bf16
    b2 = p_ref[R_B23:R_B23 + 1, 0:128].astype(f32)
    c2 = jnp.maximum(
        jnp.dot(pooled.astype(bf16), w2, preferred_element_type=f32) + b2, 0.0)

    # conv3 + ReLU: conv2 output is already the conv3 im2col patch -> embedding (T, 64).
    w3 = p_ref[R_W3:R_W3 + N_W3, 128:192]                             # (128, 64) bf16
    b3 = p_ref[R_B23:R_B23 + 1, 128:192].astype(f32)
    emb = jnp.maximum(
        jnp.dot(c2.astype(bf16), w3, preferred_element_type=f32) + b3, 0.0)

    # fused actor/critic hidden layer: h lanes 0..63 actor, 64..127 critic.
    wh1 = p_ref[R_WH1:R_WH1 + N_WH1, 128:256]                         # (64, 128) bf16
    bh1 = p_ref[R_BH1:R_BH1 + 1, 0:128].astype(f32)
    h = jnp.tanh(jnp.dot(emb.astype(bf16), wh1, preferred_element_type=f32) + bh1)

    # fused output layer (compact): lanes 0..6 logits, lane 7 value, lanes 8..63 zero.
    wh2 = p_ref[R_WH2:R_WH2 + N_WH2, 192:256]                         # (128, 64) bf16
    bh2 = p_ref[R_BH2:R_BH2 + 1, 0:64].astype(f32)
    out = jnp.dot(h.astype(bf16), wh2, preferred_element_type=f32) + bh2      # (T, 64)

    # masked log-softmax over the action lanes; value lane passes through untouched.
    lane = jax.lax.broadcasted_iota(jnp.int32, out.shape, 1)
    is_act = lane < N_ACTIONS
    neg = jnp.finfo(jnp.float32).min
    masked = jnp.where(is_act, out, neg)
    m = jnp.max(masked, axis=1, keepdims=True)
    e = jnp.exp(masked - m)                    # masked lanes -> exp(-huge) == 0, no inf
    lse = m + jnp.log(jnp.sum(e, axis=1, keepdims=True))
    out_ref[...] = jnp.where(is_act, out - lse, jnp.where(lane == N_ACTIONS, out, 0.0))


def ac_model_forward(image_nhwc, memory, packed_params):
    """image_nhwc: (B, 7, 7, 3) float; memory: (B, 2*EMB) passthrough;
    packed_params: (456, 256) bf16 slab from pack_params()."""
    b = image_nhwc.shape[0]
    bp = max(8, -(-b // 8) * 8)                  # pad batch to a sublane multiple
    if bp > MAX_TILE:
        bp = -(-bp // MAX_TILE) * MAX_TILE       # tile large stacked batches
        tile = MAX_TILE
    else:
        tile = bp

    x = image_nhwc.astype(jnp.float32)
    if bp != b:
        x = jnp.pad(x, ((0, bp - b), (0, 0), (0, 0), (0, 0)))

    # host-side conv1 im2col, batch-major (no transpose): (BP, 4*192) bf16.
    patch = x[:, _PATCH_I, _PATCH_J, :].reshape(bp, N_TAPS * PATCH_LANES)
    patch = patch.astype(jnp.bfloat16)

    out = pl.pallas_call(
        _acmodel_kernel,
        out_shape=jax.ShapeDtypeStruct((bp, 64), jnp.float32),
        grid=(bp // tile,),
        in_specs=[
            pl.BlockSpec((tile, N_TAPS * PATCH_LANES), lambda i: (i, 0)),
            pl.BlockSpec((P_ROWS, P_LANES), lambda i: (0, 0)),   # params fetched once
        ],
        out_specs=pl.BlockSpec((tile, 64), lambda i: (i, 0)),
        compiler_params=pltpu.CompilerParams(dimension_semantics=("parallel",)),
    )(patch, packed_params)

    # TODO(synk): torch.distributions.Categorical has no kernel equivalent; the
    # kernel returns its defining log-softmax logits instead.
    dist_logits = out[:b, :N_ACTIONS]
    value = out[:b, N_ACTIONS]          # == critic(x).squeeze(1)
    return dist_logits, value, memory   # memory unchanged (use_memory=False)


def make_params(key):
    """Stand-in parameters mirroring the torch module's shapes.
    Conv weights stored per-tap: w[t] has shape (cin, cout), t = di*2 + dj."""
    ks = jax.random.split(key, 7)

    def conv_w(k, cin, cout):
        # TODO(synk): torch Conv2d default init is uniform (incl. bias); this is a
        # deterministic scaled-normal stand-in (harmless for the kernel itself).
        return jax.random.normal(k, (4, cin, cout), jnp.float32) / jnp.sqrt(4.0 * cin)

    def conv_b(cout):
        return jnp.zeros((1, cout), jnp.float32)

    def linear(k, din, dout):
        # init_params: weight ~ N(0,1), each output unit L2-normalized over its
        # inputs (our weight is (in,out) -> normalize columns), bias = 0.
        w = jax.random.normal(k, (din, dout), jnp.float32)
        w = w / jnp.sqrt(jnp.sum(w * w, axis=0, keepdims=True))
        return w, jnp.zeros((1, dout), jnp.float32)

    w1, b1 = conv_w(ks[0], CIN, C1), conv_b(C1)
    w2, b2 = conv_w(ks[1], C1, C2), conv_b(C2)
    w3, b3 = conv_w(ks[2], C2, C3), conv_b(C3)
    wa1, ba1 = linear(ks[3], EMB, 64)
    wa2, ba2 = linear(ks[4], 64, N_ACTIONS)
    wc1, bc1 = linear(ks[5], EMB, 64)
    wc2, bc2 = linear(ks[6], 64, 1)
    return (w1, b1, w2, b2, w3, b3, wa1, ba1, wa2, ba2, wc1, bc1, wc2, bc2)


def pack_params(params):
    """Pack all weights/biases into one (456, 256) bf16 slab (host-side, once)."""
    (w1, b1, w2, b2, w3, b3, wa1, ba1, wa2, ba2, wc1, bc1, wc2, bc2) = params
    f32 = jnp.float32
    w1m = w1.reshape(4 * CIN, C1)                      # rows: conv1_tap*3  + cin
    w2m = w2.reshape(4 * C1, C2)                       # rows: conv2_tap*16 + c1
    w3m = w3.reshape(4 * C2, C3)                       # rows: conv3_tap*32 + c2
    w1_blk = jnp.kron(jnp.eye(16, dtype=f32), w1m)     # (192, 256) block-diagonal
    w2_blk = jnp.kron(jnp.eye(4, dtype=f32), w2m)      # (256, 128) block-diagonal
    wh1 = jnp.concatenate([wa1, wc1], axis=1)          # (64, 128)
    wh2 = jnp.zeros((128, 64), f32)                    # compact head-2
    wh2 = wh2.at[0:64, 0:N_ACTIONS].set(wa2)
    wh2 = wh2.at[64:128, N_ACTIONS].set(wc2[:, 0])
    bh2 = jnp.zeros((64,), f32)
    bh2 = bh2.at[0:N_ACTIONS].set(ba2[0])
    bh2 = bh2.at[N_ACTIONS].set(bc2[0, 0])

    slab = jnp.zeros((P_ROWS, P_LANES), f32)
    slab = slab.at[R_W1:R_W1 + N_W1, :].set(w1_blk)
    slab = slab.at[R_W2:R_W2 + N_W2, 0:128].set(w2_blk)
    slab = slab.at[R_W3:R_W3 + N_W3, 128:192].set(w3m)
    slab = slab.at[R_WH2:R_WH2 + N_WH2, 192:256].set(wh2)
    slab = slab.at[R_WH1:R_WH1 + N_WH1, 128:256].set(wh1)
    slab = slab.at[R_B1, :].set(jnp.tile(b1[0], 16))
    slab = slab.at[R_B23, 0:128].set(jnp.tile(b2[0], 4))
    slab = slab.at[R_B23, 128:192].set(b3[0])
    slab = slab.at[R_BH1, 0:128].set(jnp.concatenate([ba1[0], bc1[0]]))
    slab = slab.at[R_BH2, 0:64].set(bh2)
    return slab.astype(jnp.bfloat16)


def _reference_forward(image, params):
    """Pure-JAX f32 reference of the PyTorch forward (use_memory/use_text disabled)."""
    (w1, b1, w2, b2, w3, b3, wa1, ba1, wa2, ba2, wc1, bc1, wc2, bc2) = params
    hi = jax.lax.Precision.HIGHEST
    x = image.astype(jnp.float32)

    def conv2x2_relu(inp, w, bias):                    # inp (B,h,w,cin); w (4,cin,cout)
        hh, ww = inp.shape[1], inp.shape[2]
        rows = []
        for i in range(hh - 1):
            cols = []
            for j in range(ww - 1):
                acc = bias[0]
                for t in range(4):
                    di, dj = divmod(t, 2)
                    acc = acc + jnp.dot(inp[:, i + di, j + dj, :], w[t], precision=hi)
                cols.append(acc)
            rows.append(jnp.stack(cols, axis=1))
        return jnp.maximum(jnp.stack(rows, axis=1), 0.0)

    c1 = conv2x2_relu(x, w1, b1)                                   # (B,6,6,16)
    nb = c1.shape[0]
    p1 = jnp.max(c1.reshape(nb, 3, 2, 3, 2, C1), axis=(2, 4))      # (B,3,3,16)
    c2 = conv2x2_relu(p1, w2, b2)                                  # (B,2,2,32)
    emb = conv2x2_relu(c2, w3, b3)[:, 0, 0, :]                     # (B,64)
    ha = jnp.tanh(jnp.dot(emb, wa1, precision=hi) + ba1)
    logits = jnp.dot(ha, wa2, precision=hi) + ba2
    logp = jax.nn.log_softmax(logits, axis=-1)
    hc = jnp.tanh(jnp.dot(emb, wc1, precision=hi) + bc1)
    value = (jnp.dot(hc, wc2, precision=hi) + bc2)[:, 0]
    return logp, value


if __name__ == "__main__":
    key = jax.random.PRNGKey(0)
    k_img, k_par = jax.random.split(key)

    # obs.image like MiniGrid: small integer-valued grid of shape (B, 7, 7, 3)
    image = jax.random.randint(k_img, (B, H, W, CIN), 0, 11).astype(jnp.float32)
    memory = jnp.zeros((B, MEMORY_SIZE), jnp.float32)
    params = make_params(k_par)
    packed = pack_params(params)            # one-time host-side packing (bf16 slab)

    fwd = jax.jit(ac_model_forward)
    dist_logits, value, memory_out = fwd(image, memory, packed)
    jax.block_until_ready((dist_logits, value, memory_out))

    assert dist_logits.shape == (B, N_ACTIONS)
    assert value.shape == (B,)
    assert memory_out.shape == (B, MEMORY_SIZE)
    # log_softmax rows must exponentiate to a valid categorical distribution
    assert jnp.allclose(jnp.sum(jnp.exp(dist_logits), axis=1), 1.0, atol=1e-4)

    # numerical check against a pure-JAX f32 (HIGHEST precision) reference.
    # bf16 weights + bf16 matmul operands add ~1e-2..3e-2 absolute error vs f32.
    ref_logp, ref_value = _reference_forward(image, params)
    assert jnp.allclose(dist_logits, ref_logp, rtol=5e-2, atol=7.5e-2)
    assert jnp.allclose(value, ref_value, rtol=5e-2, atol=7.5e-2)

    print("KERNEL_OK")
</pallas_src>

<mosaic_0001>
module attributes {stable_mosaic.version = 11 : i64} {
  func.func @_acmodel_kernel(%arg0: i32, %arg1: memref<8x768xbf16, #tpu.memory_space<vmem>>, %arg2: memref<456x256xbf16, #tpu.memory_space<vmem>>, %arg3: memref<8x64xf32, #tpu.memory_space<vmem>>) attributes {dimension_semantics = [#tpu.dimension_semantics<parallel>], iteration_bounds = array<i64: 1>, scalar_prefetch = 0 : i64, scratch_operands = 0 : i64, tpu.core_type = #tpu.core_type<tc>, window_params = [{transform_indices = @transform_0, window_bounds = array<i64: 8, 768>}, {pipeline_mode = #tpu.pipeline_mode<synchronous>, transform_indices = @transform_1, window_bounds = array<i64: 456, 256>}, {transform_indices = @transform_2, window_bounds = array<i64: 8, 64>}]} {
    %c0 = arith.constant 0 : index
    %c0_0 = arith.constant 0 : index
    %0 = vector.load %arg2[%c0, %c0_0] : memref<456x256xbf16, #tpu.memory_space<vmem>>, vector<192x256xbf16>
    %c448 = arith.constant 448 : index
    %c0_1 = arith.constant 0 : index
    %1 = vector.load %arg2[%c448, %c0_1] : memref<456x256xbf16, #tpu.memory_space<vmem>>, vector<1x256xbf16>
    %2 = arith.extf %1 : vector<1x256xbf16> to vector<1x256xf32>
    %c0_2 = arith.constant 0 : index
    %c0_3 = arith.constant 0 : index
    %3 = vector.load %arg1[%c0_2, %c0_3] : memref<8x768xbf16, #tpu.memory_space<vmem>>, vector<8x192xbf16>
    %cst = arith.constant dense<0.000000e+00> : vector<8x256xf32>
    %4 = tpu.matmul %3, %0, %cst {dimension_numbers = #tpu.dot_dimension_numbers<[1], [0], [0], [1], [0, 0, 1, 1], [], []>} : vector<8x192xbf16>, vector<192x256xbf16>, vector<8x256xf32> -> vector<8x256xf32>
    %5 = vector.broadcast %2 : vector<1x256xf32> to vector<8x256xf32>
    %6 = arith.addf %4, %5 : vector<8x256xf32>
    %cst_4 = arith.constant 0.000000e+00 : f32
    %7 = vector.broadcast %cst_4 : f32 to vector<8x256xf32>
    %8 = arith.maximumf %6, %7 : vector<8x256xf32>
    %c0_5 = arith.constant 0 : index
    %c192 = arith.constant 192 : index
    %9 = vector.load %arg1[%c0_5, %c192] : memref<8x768xbf16, #tpu.memory_space<vmem>>, vector<8x192xbf16>
    %cst_6 = arith.constant dense<0.000000e+00> : vector<8x256xf32>
    %10 = tpu.matmul %9, %0, %cst_6 {dimension_numbers = #tpu.dot_dimension_numbers<[1], [0], [0], [1], [0, 0, 1, 1], [], []>} : vector<8x192xbf16>, vector<192x256xbf16>, vector<8x256xf32> -> vector<8x256xf32>
    %11 = vector.broadcast %2 : vector<1x256xf32> to vector<8x256xf32>
    %12 = arith.addf %10, %11 : vector<8x256xf32>
    %cst_7 = arith.constant 0.000000e+00 : f32
    %13 = vector.broadcast %cst_7 : f32 to vector<8x256xf32>
    %14 = arith.maximumf %12, %13 : vector<8x256xf32>
    %15 = arith.maximumf %8, %14 : vector<8x256xf32>
    %c0_8 = arith.constant 0 : index
    %c384 = arith.constant 384 : index
    %16 = vector.load %arg1[%c0_8, %c384] : memref<8x768xbf16, #tpu.memory_space<vmem>>, vector<8x192xbf16>
    %cst_9 = arith.constant dense<0.000000e+00> : vector<8x256xf32>
    %17 = tpu.matmul %16, %0, %cst_9 {dimension_numbers = #tpu.dot_dimension_numbers<[1], [0], [0], [1], [0, 0, 1, 1], [], []>} : vector<8x192xbf16>, vector<192x256xbf16>, vector<8x256xf32> -> vector<8x256xf32>
    %18 = vector.broadcast %2 : vector<1x256xf32> to vector<8x256xf32>
    %19 = arith.addf %17, %18 : vector<8x256xf32>
    %cst_10 = arith.constant 0.000000e+00 : f32
    %20 = vector.broadcast %cst_10 : f32 to vector<8x256xf32>
    %21 = arith.maximumf %19, %20 : vector<8x256xf32>
    %22 = arith.maximumf %15, %21 : vector<8x256xf32>
    %c0_11 = arith.constant 0 : index
    %c576 = arith.constant 576 : index
    %23 = vector.load %arg1[%c0_11, %c576] : memref<8x768xbf16, #tpu.memory_space<vmem>>, vector<8x192xbf16>
    %cst_12 = arith.constant dense<0.000000e+00> : vector<8x256xf32>
    %24 = tpu.matmul %23, %0, %cst_12 {dimension_numbers = #tpu.dot_dimension_numbers<[1], [0], [0], [1], [0, 0, 1, 1], [], []>} : vector<8x192xbf16>, vector<192x256xbf16>, vector<8x256xf32> -> vector<8x256xf32>
    %25 = vector.broadcast %2 : vector<1x256xf32> to vector<8x256xf32>
    %26 = arith.addf %24, %25 : vector<8x256xf32>
    %cst_13 = arith.constant 0.000000e+00 : f32
    %27 = vector.broadcast %cst_13 : f32 to vector<8x256xf32>
    %28 = arith.maximumf %26, %27 : vector<8x256xf32>
    %29 = arith.maximumf %22, %28 : vector<8x256xf32>
    %c192_14 = arith.constant 192 : index
    %c0_15 = arith.constant 0 : index
    %30 = vector.load %arg2[%c192_14, %c0_15] : memref<456x256xbf16, #tpu.memory_space<vmem>>, vector<256x128xbf16>
    %c450 = arith.constant 450 : index
    %c0_16 = arith.constant 0 : index
    %31 = vector.load %arg2[%c450, %c0_16] : memref<456x256xbf16, #tpu.memory_space<vmem>>, vector<1x128xbf16>
    %32 = arith.extf %31 : vector<1x128xbf16> to vector<1x128xf32>
    %33 = arith.truncf %29 : vector<8x256xf32> to vector<8x256xbf16>
    %cst_17 = arith.constant dense<0.000000e+00> : vector<8x128xf32>
    %34 = tpu.matmul %33, %30, %cst_17 {dimension_numbers = #tpu.dot_dimension_numbers<[1], [0], [0], [1], [0, 0, 1, 1], [], []>} : vector<8x256xbf16>, vector<256x128xbf16>, vector<8x128xf32> -> vector<8x128xf32>
    %35 = vector.broadcast %32 : vector<1x128xf32> to vector<8x128xf32>
    %36 = arith.addf %34, %35 : vector<8x128xf32>
    %cst_18 = arith.constant 0.000000e+00 : f32
    %37 = vector.broadcast %cst_18 : f32 to vector<8x128xf32>
    %38 = arith.maximumf %36, %37 : vector<8x128xf32>
    %c192_19 = arith.constant 192 : index
    %c128 = arith.constant 128 : index
    %39 = vector.load %arg2[%c192_19, %c128] : memref<456x256xbf16, #tpu.memory_space<vmem>>, vector<128x64xbf16>
    %c450_20 = arith.constant 450 : index
    %c128_21 = arith.constant 128 : index
    %40 = vector.load %arg2[%c450_20, %c128_21] : memref<456x256xbf16, #tpu.memory_space<vmem>>, vector<1x64xbf16>
    %41 = arith.extf %40 : vector<1x64xbf16> to vector<1x64xf32>
    %42 = arith.truncf %38 : vector<8x128xf32> to vector<8x128xbf16>
    %cst_22 = arith.constant dense<0.000000e+00> : vector<8x64xf32>
    %43 = tpu.matmul %42, %39, %cst_22 {dimension_numbers = #tpu.dot_dimension_numbers<[1], [0], [0], [1], [0, 0, 1, 1], [], []>} : vector<8x128xbf16>, vector<128x64xbf16>, vector<8x64xf32> -> vector<8x64xf32>
    %44 = vector.broadcast %41 : vector<1x64xf32> to vector<8x64xf32>
    %45 = arith.addf %43, %44 : vector<8x64xf32>
    %cst_23 = arith.constant 0.000000e+00 : f32
    %46 = vector.broadcast %cst_23 : f32 to vector<8x64xf32>
    %47 = arith.maximumf %45, %46 : vector<8x64xf32>
    %c320 = arith.constant 320 : index
    %c128_24 = arith.constant 128 : index
    %48 = vector.load %arg2[%c320, %c128_24] : memref<456x256xbf16, #tpu.memory_space<vmem>>, vector<64x128xbf16>
    %c452 = arith.constant 452 : index
    %c0_25 = arith.constant 0 : index
    %49 = vector.load %arg2[%c452, %c0_25] : memref<456x256xbf16, #tpu.memory_space<vmem>>, vector<1x128xbf16>
    %50 = arith.extf %49 : vector<1x128xbf16> to vector<1x128xf32>
    %51 = arith.truncf %47 : vector<8x64xf32> to vector<8x64xbf16>
    %cst_26 = arith.constant dense<0.000000e+00> : vector<8x128xf32>
    %52 = tpu.matmul %51, %48, %cst_26 {dimension_numbers = #tpu.dot_dimension_numbers<[1], [0], [0], [1], [0, 0, 1, 1], [], []>} : vector<8x64xbf16>, vector<64x128xbf16>, vector<8x128xf32> -> vector<8x128xf32>
    %53 = vector.broadcast %50 : vector<1x128xf32> to vector<8x128xf32>
    %54 = arith.addf %52, %53 : vector<8x128xf32>
    %55 = math.tanh %54 : vector<8x128xf32>
    %c192_27 = arith.constant 192 : index
    %c192_28 = arith.constant 192 : index
    %56 = vector.load %arg2[%c192_27, %c192_28] : memref<456x256xbf16, #tpu.memory_space<vmem>>, vector<128x64xbf16>
    %c454 = arith.constant 454 : index
    %c0_29 = arith.constant 0 : index
    %57 = vector.load %arg2[%c454, %c0_29] : memref<456x256xbf16, #tpu.memory_space<vmem>>, vector<1x64xbf16>
    %58 = arith.extf %57 : vector<1x64xbf16> to vector<1x64xf32>
    %59 = arith.truncf %55 : vector<8x128xf32> to vector<8x128xbf16>
    %cst_30 = arith.constant dense<0.000000e+00> : vector<8x64xf32>
    %60 = tpu.matmul %59, %56, %cst_30 {dimension_numbers = #tpu.dot_dimension_numbers<[1], [0], [0], [1], [0, 0, 1, 1], [], []>} : vector<8x128xbf16>, vector<128x64xbf16>, vector<8x64xf32> -> vector<8x64xf32>
    %61 = vector.broadcast %58 : vector<1x64xf32> to vector<8x64xf32>
    %62 = arith.addf %60, %61 : vector<8x64xf32>
    %63 = tpu.iota {dimensions = array<i32: 1>} : vector<8x64xi32>
    %c7_i32 = arith.constant 7 : i32
    %64 = vector.broadcast %c7_i32 : i32 to vector<8x64xi32>
    %65 = arith.cmpi slt, %63, %64 : vector<8x64xi32>
    %cst_31 = arith.constant -3.40282347E+38 : f32
    %66 = vector.broadcast %cst_31 : f32 to vector<8x64xf32>
    %67 = arith.select %65, %62, %66 : vector<8x64xi1>, vector<8x64xf32>
    %cst_32 = arith.constant dense<0xFF800000> : vector<8xf32>
    %68 = vector.multi_reduction <maximumf>, %67, %cst_32 [1] : vector<8x64xf32> to vector<8xf32>
    %69 = vector.shape_cast %68 : vector<8xf32> to vector<8x1xf32>
    %70 = vector.broadcast %69 : vector<8x1xf32> to vector<8x64xf32>
    %71 = arith.subf %67, %70 : vector<8x64xf32>
    %72 = math.exp %71 : vector<8x64xf32>
    %cst_33 = arith.constant dense<0.000000e+00> : vector<8xf32>
    %73 = vector.multi_reduction <add>, %72, %cst_33 [1] : vector<8x64xf32> to vector<8xf32>
    %74 = vector.shape_cast %73 : vector<8xf32> to vector<8x1xf32>
    %75 = math.log %74 : vector<8x1xf32>
    %76 = arith.addf %69, %75 : vector<8x1xf32>
    %77 = vector.broadcast %76 : vector<8x1xf32> to vector<8x64xf32>
    %78 = arith.subf %62, %77 : vector<8x64xf32>
    %c7_i32_34 = arith.constant 7 : i32
    %79 = vector.broadcast %c7_i32_34 : i32 to vector<8x64xi32>
    %80 = arith.cmpi eq, %63, %79 : vector<8x64xi32>
    %cst_35 = arith.constant 0.000000e+00 : f32
    %81 = vector.broadcast %cst_35 : f32 to vector<8x64xf32>
    %82 = arith.select %80, %62, %81 : vector<8x64xi1>, vector<8x64xf32>
    %83 = arith.select %65, %78, %82 : vector<8x64xi1>, vector<8x64xf32>
    %c0_36 = arith.constant 0 : index
    %c0_37 = arith.constant 0 : index
    %84 = vector.load %arg3[%c0_36, %c0_37] : memref<8x64xf32, #tpu.memory_space<vmem>>, vector<8x64xf32>
    tpu.vector_store %arg3[%c0_36, %c0_37], %83 {strides = array<i32>} : memref<8x64xf32, #tpu.memory_space<vmem>>, vector<8x64xf32>,
    return
  }
  func.func @transform_0(%arg0: i32) -> (i32, i32) {
    %c0_i32 = arith.constant 0 : i32
    %c0_i32_0 = arith.constant 0 : i32
    return %arg0, %c0_i32 : i32, i32
  }
  func.func @transform_1(%arg0: i32) -> (i32, i32) {
    %c0_i32 = arith.constant 0 : i32
    %c0_i32_0 = arith.constant 0 : i32
    %c0_i32_1 = arith.constant 0 : i32
    return %c0_i32, %c0_i32_0 : i32, i32
  }
  func.func @transform_2(%arg0: i32) -> (i32, i32) {
    %c0_i32 = arith.constant 0 : i32
    %c0_i32_0 = arith.constant 0 : i32
    return %arg0, %c0_i32 : i32, i32
  }
}

</mosaic_0001>

<bundles_post_ra>
// kernel: ac_model_forward.1
= control target key start
LH: loop header
LB: loop body
LE: loop exit
PB: predicated region body
PF: predicated region fallthrough
CT: control target
= control target key end

     0   :  { %s1108_s17 = smov 64   ;;  %vm174_vm0 = vcmask 523264   ;;  %v1109_v63 = vmov 0.0   ;;  %vm1110_vm1 = vmmov 0   ;;  %s1514_s0 = inlined_call_operand.vmem [shape: bf16[8,768], index: 0, kind: input, shape index: {}]   ;;  %s1515_s1 = inlined_call_operand.vmem [shape: bf16[456,256], index: 1, kind: input, shape index: {}]   ;;  %s1516_s2 = inlined_call_operand.vmem [shape: f32[8,64], index: 2, kind: output, shape index: {}]  }
   0x1   :  { %v221_v0 = vld [vmem:[%s1514_s0 + $0x4] sm:$0xff]  ;;  %v1142_v4 = vld [vmem:[%s1515_s1 + $0x14] ss:$8 sps:$4 sm:$0xff]   ;;  %v1150_v6 = vld [vmem:[%s1515_s1 + $0x10] ss:$8 sps:$4 sm:$0xff]  }
   0x2   :  { %v892_v1 = vcombine.low %v221_v0, %v221_v0  ;;  %v1132_v2 = vld [vmem:[%s1515_s1 + $0x4] ss:$8 sps:$4 sm:$0xff]   ;;  %v1137_v3 = vld [vmem:[%s1515_s1] ss:$8 sps:$4 sm:$0xff]   ;;  %v893_v5 = vcombine.high %v221_v0, %v221_v0  ;;  %v337_v8 = vld [vmem:[%s1514_s0 + $0x10] sm:$0xff] }
   0x3   :  { %178 = vmatprep.subr.bf16.mxu0 %v1132_v2  ;;  %237 = vmatprep.subr.bf16.mxu1 %v1132_v2  ;;  %v1157_v7 = vld [vmem:[%s1515_s1 + $0x24] ss:$8 sps:$4 sm:$0xff]   ;;  %v1169_v9 = vld [vmem:[%s1515_s1 + $0x20] ss:$8 sps:$4 sm:$0xff]   ;;  %v898_v10 = vcombine.low %v337_v8, %v337_v8  ;;  %v1175_v11 = vld [vmem:[%s1515_s1 + $0x34] ss:$8 sps:$4 sm:$0xff]   ;;  %v899_v12 = vcombine.high %v337_v8, %v337_v8 }
   0x4   :  { %227 = vrot.lane.b32.xlu0 %v892_v1, %s1108_s17  ;;  %179 = vmatpush1.bf16.msra.mxu0 %v1137_v3  ;;  %v1184_v13 = vld [vmem:[%s1515_s1 + $0x30] ss:$8 sps:$4 sm:$0xff]   ;;  %v1190_v14 = vld [vmem:[%s1515_s1 + $0x44] ss:$8 sps:$4 sm:$0xff]   ;;  %v1199_v15 = vld [vmem:[%s1515_s1 + $0x40] ss:$8 sps:$4 sm:$0xff]  }
   0x5   :  { %180 = vmatprep.subr.bf16.mxu0 %v1142_v4  ;;  %238 = vmatpush1.bf16.msra.mxu1 %v1137_v3  ;;  %v39_v16 = vld [vmem:[%s1514_s0] sm:$0xff]  ;;  %v1208_v17 = vld [vmem:[%s1515_s1 + $0x54] ss:$8 sps:$4 sm:$0xff]   ;;  %v1214_v19 = vld [vmem:[%s1515_s1 + $0x50] ss:$8 sps:$4 sm:$0xff]  }
   0x6   :  { %239 = vmatprep.subr.bf16.mxu1 %v1142_v4  ;;  %343 = vrot.lane.b32.xlu1 %v898_v10, %s1108_s17  ;;  %v866_v18 = vcombine.high %v39_v16, %v39_v16  ;;  %v1220_v20 = vld [vmem:[%s1515_s1 + $0x64] ss:$8 sps:$4 sm:$0xff]   ;;  %v1229_v21 = vld [vmem:[%s1515_s1 + $0x60] ss:$8 sps:$4 sm:$0xff]   ;;  %v1235_v22 = vld [vmem:[%s1515_s1 + $0x74] ss:$8 sps:$4 sm:$0xff]   ;;  %v865_v33 = vcombine.low %v39_v16, %v39_v16 }
   0x7   :  { %v1243_v23 = vld [vmem:[%s1515_s1 + $0x70] ss:$8 sps:$4 sm:$0xff]   ;;  %v1249_v24 = vld [vmem:[%s1515_s1 + $0x84] ss:$8 sps:$4 sm:$0xff]   ;;  %v1257_v25 = vld [vmem:[%s1515_s1 + $0x80] ss:$8 sps:$4 sm:$0xff]  }
   0x8   :  { %229 = vrot.lane.b32.xlu0 %v893_v5, %s1108_s17  ;;  %181 = vmatpush1.bf16.msra.mxu0 %v1150_v6  ;;  %v1263_v26 = vld [vmem:[%s1515_s1 + $0x94] ss:$8 sps:$4 sm:$0xff]   ;;  %v1273_v27 = vld [vmem:[%s1515_s1 + $0x90] ss:$8 sps:$4 sm:$0xff]   ;;  %v1279_v28 = vld [vmem:[%s1515_s1 + $0xa4] ss:$8 sps:$4 sm:$0xff]  }
   0x9   :  { %182 = vmatprep.subr.bf16.mxu0 %v1157_v7  ;;  %240 = vmatpush1.bf16.msra.mxu1 %v1150_v6  ;;  %v1287_v29 = vld [vmem:[%s1515_s1 + $0xa0] ss:$8 sps:$4 sm:$0xff]   ;;  %v1293_v30 = vld [vmem:[%s1515_s1 + $0xb4] ss:$8 sps:$4 sm:$0xff]   ;;  %v1301_v31 = vld [vmem:[%s1515_s1 + $0xb0] ss:$8 sps:$4 sm:$0xff]  }
   0xa   :  { %241 = vmatprep.subr.bf16.mxu1 %v1157_v7  ;;  %345 = vrot.lane.b32.xlu1 %v899_v12, %s1108_s17  ;;  %v282_v32 = vld [vmem:[%s1514_s0 + $0xc] sm:$0xff]  ;;  %v1074_v42 = vld [vmem:[%s1515_s1 + $0x140] ss:$8 sps:$4 sm:$0xff]   ;;  %v1091_v0 = vld [vmem:[%s1515_s1 + $0xd4] ss:$8 sps:$4 sm:$0xff]  }
   0xb   :  { %891 = vmatprep.mubr.msk.bf16.mxu0 %vm174_vm0, %v866_v18  ;;  %v896_v34 = vcombine.high %v282_v32, %v282_v32  ;;  %v895_v35 = vcombine.low %v282_v32, %v282_v32  ;;  %v1075_v43 = vld [vmem:[%s1515_s1 + $0xc0] ss:$8 sps:$4 sm:$0xff]   ;;  %v1076_v44 = vld [vmem:[%s1515_s1 + $0x150] ss:$8 sps:$4 sm:$0xff]   ;;  %v1090_v62 = vld [vmem:[%s1515_s1 + $0xc4] ss:$8 sps:$4 sm:$0xff]  }
   0xc   :  { %183 = vmatpush1.bf16.msra.mxu0 %v1169_v9  ;;  %v1077_v45 = vld [vmem:[%s1515_s1 + $0xd0] ss:$8 sps:$4 sm:$0xff]   ;;  %v1078_v46 = vld [vmem:[%s1515_s1 + $0x160] ss:$8 sps:$4 sm:$0xff]   ;;  %776 = vrot.lane.b32.xlu0 %v1090_v62, %s1108_s17  ;;  %v1092_v1 = vld [vmem:[%s1515_s1 + $0xe4] ss:$8 sps:$4 sm:$0xff]  }
   0xd   :  { %184 = vmatprep.subr.bf16.mxu0 %v1175_v11  ;;  %242 = vmatpush1.bf16.msra.mxu1 %v1169_v9  ;;  %v1079_v47 = vld [vmem:[%s1515_s1 + $0xe0] ss:$8 sps:$4 sm:$0xff]   ;;  %v1080_v48 = vld [vmem:[%s1515_s1 + $0x170] ss:$8 sps:$4 sm:$0xff]  }
   0xe   :  { %243 = vmatprep.subr.bf16.mxu1 %v1175_v11  ;;  %v1081_v49 = vld [vmem:[%s1515_s1 + $0xf0] ss:$8 sps:$4 sm:$0xff]   ;;  %v1082_v50 = vld [vmem:[%s1515_s1 + $0x180] ss:$8 sps:$4 sm:$0xff]   ;;  %778 = vrot.lane.b32.xlu1 %v1091_v0, %s1108_s17 }
   0xf   :  { %v1083_v51 = vld [vmem:[%s1515_s1 + $0x100] ss:$8 sps:$4 sm:$0xff]   ;;  %v1084_v52 = vld [vmem:[%s1515_s1 + $0x190] ss:$8 sps:$4 sm:$0xff]  }
  0x10   :  { %185 = vmatpush1.bf16.msra.mxu0 %v1184_v13  ;;  %v1085_v53 = vld [vmem:[%s1515_s1 + $0x110] ss:$8 sps:$4 sm:$0xff]   ;;  %v1086_v54 = vld [vmem:[%s1515_s1 + $0x1a0] ss:$8 sps:$4 sm:$0xff]   ;;  %780 = vrot.lane.b32.xlu0 %v1092_v1, %s1108_s17 }
  0x11   :  { %186 = vmatprep.subr.bf16.mxu0 %v1190_v14  ;;  %244 = vmatpush1.bf16.msra.mxu1 %v1184_v13  ;;  %v1087_v55 = vld [vmem:[%s1515_s1 + $0x120] ss:$8 sps:$4 sm:$0xff]   ;;  %v1088_v56 = vld [vmem:[%s1515_s1 + $0x1b0] ss:$8 sps:$4 sm:$0xff]  }
  0x12   :  { %245 = vmatprep.subr.bf16.mxu1 %v1190_v14  ;;  %v1089_v57 = vld [vmem:[%s1515_s1 + $0x130] ss:$8 sps:$4 sm:$0xff]  }
  0x14   :  { %187 = vmatpush1.bf16.msra.mxu0 %v1199_v15 }
  0x15   :  { %188 = vmatprep.subr.bf16.mxu0 %v1208_v17  ;;  %246 = vmatpush1.bf16.msra.mxu1 %v1199_v15 }
  0x16   :  { %247 = vmatprep.subr.bf16.mxu1 %v1208_v17 }
  0x18   :  { %189 = vmatpush1.bf16.msra.mxu0 %v1214_v19 }
  0x19   :  { %190 = vmatprep.subr.bf16.mxu0 %v1220_v20  ;;  %248 = vmatpush1.bf16.msra.mxu1 %v1214_v19 }
  0x1a   :  { %249 = vmatprep.subr.bf16.mxu1 %v1220_v20 }
  0x1c   :  { %191 = vmatpush1.bf16.msra.mxu0 %v1229_v21 }
  0x1d   :  { %192 = vmatprep.subr.bf16.mxu0 %v1235_v22  ;;  %250 = vmatpush1.bf16.msra.mxu1 %v1229_v21 }
  0x1e   :  { %251 = vmatprep.subr.bf16.mxu1 %v1235_v22 }
  0x20   :  { %193 = vmatpush1.bf16.msra.mxu0 %v1243_v23 }
  0x21   :  { %194 = vmatprep.subr.bf16.mxu0 %v1249_v24  ;;  %252 = vmatpush1.bf16.msra.mxu1 %v1243_v23 }
  0x22   :  { %253 = vmatprep.subr.bf16.mxu1 %v1249_v24 }
  0x24   :  { %195 = vmatpush1.bf16.msra.mxu0 %v1257_v25 }
  0x25   :  { %196 = vmatprep.subr.bf16.mxu0 %v1263_v26  ;;  %254 = vmatpush1.bf16.msra.mxu1 %v1257_v25 }
  0x26   :  { %255 = vmatprep.subr.bf16.mxu1 %v1263_v26 }
  0x28   :  { %197 = vmatpush1.bf16.msra.mxu0 %v1273_v27 }
  0x29   :  { %198 = vmatprep.subr.bf16.mxu0 %v1279_v28  ;;  %256 = vmatpush1.bf16.msra.mxu1 %v1273_v27 }
  0x2a   :  { %257 = vmatprep.subr.bf16.mxu1 %v1279_v28 }
  0x2c   :  { %199 = vmatpush1.bf16.msra.mxu0 %v1287_v29 }
  0x2d   :  { %200 = vmatprep.subr.bf16.mxu0 %v1293_v30  ;;  %258 = vmatpush1.bf16.msra.mxu1 %v1287_v29 }
  0x2e   :  { %259 = vmatprep.subr.bf16.mxu1 %v1293_v30 }
  0x30   :  { %201 = vmatpush1.bf16.msra.mxu0 %v1301_v31 }
  0x31   :  { %292 = vmatprep.subr.bf16.mxu0 %v1132_v2  ;;  %260 = vmatpush1.bf16.msra.mxu1 %v1301_v31 }
  0x32   :  { %352 = vmatprep.subr.bf16.mxu1 %v1132_v2  ;;  %v1093_v2 = vld [vmem:[%s1515_s1 + $0xf4] ss:$8 sps:$4 sm:$0xff]  }
  0x33   :  { %211 = vmatmul.mubr.bf16.vlgmr.msra.gmra.mrb[0].mxu0 %v865_v33  ;;  %782 = vrot.lane.b32.xlu1 %v1093_v2, %s1108_s17 }
  0x34   :  { %293 = vmatpush1.bf16.msra.mxu0 %v1137_v3  ;;  %897 = vmatprep.mubr.msk.bf16.mxu0 %vm174_vm0, %v896_v34 }
  0x35   :  { %294 = vmatprep.subr.bf16.mxu0 %v1142_v4 }
  0x38   :  { %295 = vmatpush1.bf16.msra.mxu0 %v1150_v6 }
  0x39   :  { %296 = vmatprep.subr.bf16.mxu0 %v1157_v7 }
  0x3c   :  { %297 = vmatpush1.bf16.msra.mxu0 %v1169_v9 }
  0x3d   :  { %298 = vmatprep.subr.bf16.mxu0 %v1175_v11 }
  0x40   :  { %299 = vmatpush1.bf16.msra.mxu0 %v1184_v13 }
  0x41   :  { %300 = vmatprep.subr.bf16.mxu0 %v1190_v14 }
  0x44   :  { %301 = vmatpush1.bf16.msra.mxu0 %v1199_v15 }
  0x45   :  { %302 = vmatprep.subr.bf16.mxu0 %v1208_v17 }
  0x48   :  { %303 = vmatpush1.bf16.msra.mxu0 %v1214_v19 }
  0x49   :  { %304 = vmatprep.subr.bf16.mxu0 %v1220_v20 }
  0x4c   :  { %305 = vmatpush1.bf16.msra.mxu0 %v1229_v21 }
  0x4d   :  { %306 = vmatprep.subr.bf16.mxu0 %v1235_v22 }
  0x50   :  { %307 = vmatpush1.bf16.msra.mxu0 %v1243_v23 }
  0x51   :  { %308 = vmatprep.subr.bf16.mxu0 %v1249_v24 }
  0x54   :  { %309 = vmatpush1.bf16.msra.mxu0 %v1257_v25 }
  0x55   :  { %310 = vmatprep.subr.bf16.mxu0 %v1263_v26 }
  0x58   :  { %311 = vmatpush1.bf16.msra.mxu0 %v1273_v27 }
  0x59   :  { %312 = vmatprep.subr.bf16.mxu0 %v1279_v28 }
  0x5c   :  { %313 = vmatpush1.bf16.msra.mxu0 %v1287_v29 }
  0x5d   :  { %314 = vmatprep.subr.bf16.mxu0 %v1293_v30 }
  0x60   :  { %315 = vmatpush1.bf16.msra.mxu0 %v1301_v31 }
  0x61   :  { %930 = vmatprep.subr.bf16.mxu0 %v1074_v42 }
  0x63   :  { %325 = vmatmul.mubr.bf16.vlgmr.msra.gmra.mrb[4].mxu0 %v895_v35 }
  0x64   :  { %931 = vmatpush3.bf16.msra.mxu0 %v1075_v43 }
  0x65   :  { %932 = vmatprep.subr.bf16.mxu0 %v1076_v44 }
  0x68   :  { %933 = vmatpush3.bf16.msra.mxu0 %v1077_v45 }
  0x69   :  { %934 = vmatprep.subr.bf16.mxu0 %v1078_v46 }
  0x6c   :  { %935 = vmatpush3.bf16.msra.mxu0 %v1079_v47 }
  0x6d   :  { %936 = vmatprep.subr.bf16.mxu0 %v1080_v48 }
  0x70   :  { %937 = vmatpush3.bf16.msra.mxu0 %v1081_v49  ;;  %v1096_v49 = vld [vmem:[%s1515_s1 + $0x124] ss:$8 sps:$4 sm:$0xff]  }
  0x71   :  { %938 = vmatprep.subr.bf16.mxu0 %v1082_v50  ;;  %v1097_v50 = vld [vmem:[%s1515_s1 + $0x134] ss:$8 sps:$4 sm:$0xff]  }
  0x74   :  { %939 = vmatpush3.bf16.msra.mxu0 %v1083_v51  ;;  %v1098_v51 = vld [vmem:[%s1515_s1 + $0x144] ss:$8 sps:$4 sm:$0xff]  }
  0x75   :  { %940 = vmatprep.subr.bf16.mxu0 %v1084_v52  ;;  %v1099_v52 = vld [vmem:[%s1515_s1 + $0x154] ss:$8 sps:$4 sm:$0xff]  }
  0x76   :  { %v228_v36 = vpop.permute.xlu0 %227 }
  0x78   :  { %v344_v39 = vpop.permute.xlu1 %343  ;;  %941 = vmatpush3.bf16.msra.mxu0 %v1085_v53  ;;  %v429_v53 = vld [vmem:[%s1515_s1 + $0x1c0] sm:$0x2] }
  0x79   :  { %942 = vmatprep.subr.bf16.mxu0 %v1086_v54  ;;  %v430_v54 = vunpack.c.l.bf16 %v429_v53 }
  0x7a   :  { %v230_v37 = vpop.permute.xlu0 %229 }
  0x7b   :  { %894 = vmatprep.mubr.msk.bf16.mxu1 %vm174_vm0, %v230_v37  ;;  %v232_v38 = vsel %vm174_vm0, %v228_v36, %v230_v37 }
  0x7c   :  { %270 = vmatmul.mubr.bf16.vlgmr.msra.gmra.mrb[0].mxu1 %v232_v38  ;;  %v346_v40 = vpop.permute.xlu1 %345  ;;  %943 = vmatpush3.bf16.msra.mxu0 %v1087_v55 }
  0x7d   :  { %353 = vmatpush1.bf16.msra.mxu1 %v1137_v3  ;;  %900 = vmatprep.mubr.msk.bf16.mxu1 %vm174_vm0, %v346_v40  ;;  %v347_v41 = vsel %vm174_vm0, %v344_v39, %v346_v40  ;;  %v1094_v3 = vld [vmem:[%s1515_s1 + $0x104] ss:$8 sps:$4 sm:$0xff]  }
  0x7e   :  { %354 = vmatprep.subr.bf16.mxu1 %v1142_v4  ;;  %944 = vmatprep.subr.bf16.mxu0 %v1088_v56  ;;  %v1095_v4 = vld [vmem:[%s1515_s1 + $0x114] ss:$8 sps:$4 sm:$0xff]  }
  0x7f   :  { %784 = vrot.lane.b32.xlu0 %v1094_v3, %s1108_s17  ;;  %786 = vrot.lane.b32.xlu1 %v1095_v4, %s1108_s17 }
  0x80   :  { %945 = vmatpush3.bf16.msra.mxu0 %v1089_v57 }
  0x81   :  { %355 = vmatpush1.bf16.msra.mxu1 %v1150_v6  ;;  %995 = vmatprep.subr.bf16.mxu0 %v1109_v63 }
  0x82   :  { %356 = vmatprep.subr.bf16.mxu1 %v1157_v7 }
  0x83   :  { %788 = vrot.lane.b32.xlu0 %v1096_v49, %s1108_s17  ;;  %790 = vrot.lane.b32.xlu1 %v1097_v50, %s1108_s17 }
  0x85   :  { %357 = vmatpush1.bf16.msra.mxu1 %v1169_v9  ;;  %v40_v9 = vlaneseq }
  0x86   :  { %358 = vmatprep.subr.bf16.mxu1 %v1175_v11  ;;  %v36_v11 = vld [vmem:[%s1515_s1 + $0x1c0] sm:$0x11] }
  0x87   :  { %v1445_v10 = vshrl.u32 %v40_v9, 7  ;;  %v37_v12 = vunpack.c.l.bf16 %v36_v11 }
  0x89   :  { %359 = vmatpush1.bf16.msra.mxu1 %v1184_v13  ;;  %v42_v13 = vsub.s32 0, %v1445_v10  ;;  %v435_v55 = vsub.s32 2, %v1445_v10 }
  0x8a   :  { %360 = vmatprep.subr.bf16.mxu1 %v1190_v14  ;;  %v38_v14 = vunpack.c.h.bf16 %v36_v11  ;;  %v590_v11 = vld [vmem:[%s1515_s1 + $0x1c4] sm:$0x2] }
  0x8b   :  { %v436_v57 = vrot.slane %v430_v54, %v435_v55 }
  0x8c   :  { %v47_v16 = vrot.slane %v38_v14, %v42_v13 }
  0x8d   :  { %361 = vmatpush1.bf16.msra.mxu1 %v1199_v15  ;;  %v43_v15 = vrot.slane %v37_v12, %v42_v13  ;;  %v591_v12 = vunpack.c.l.bf16 %v590_v11 }
  0x8e   :  { %362 = vmatprep.subr.bf16.mxu1 %v1208_v17 }
  0x8f   :  { %v596_v13 = vrot.slane %v591_v12, %v435_v55 }
  0x91   :  { %363 = vmatpush1.bf16.msra.mxu1 %v1214_v19 }
  0x92   :  { %364 = vmatprep.subr.bf16.mxu1 %v1220_v20 }
  0x95   :  { %365 = vmatpush1.bf16.msra.mxu1 %v1229_v21 }
  0x96   :  { %366 = vmatprep.subr.bf16.mxu1 %v1235_v22 }
  0x99   :  { %367 = vmatpush1.bf16.msra.mxu1 %v1243_v23 }
  0x9a   :  { %368 = vmatprep.subr.bf16.mxu1 %v1249_v24 }
  0x9d   :  { %369 = vmatpush1.bf16.msra.mxu1 %v1257_v25 }
  0x9e   :  { %370 = vmatprep.subr.bf16.mxu1 %v1263_v26 }
  0xa1   :  { %371 = vmatpush1.bf16.msra.mxu1 %v1273_v27 }
  0xa2   :  { %372 = vmatprep.subr.bf16.mxu1 %v1279_v28 }
  0xa5   :  { %373 = vmatpush1.bf16.msra.mxu1 %v1287_v29 }
  0xa6   :  { %374 = vmatprep.subr.bf16.mxu1 %v1293_v30 }
  0xa9   :  { %375 = vmatpush1.bf16.msra.mxu1 %v1301_v31 }
  0xaa   :  { %975 = vmatprep.subr.bf16.mxu1 %v1109_v63 }
  0xac   :  { %385 = vmatmul.mubr.bf16.vlgmr.msra.gmra.mrb[4].mxu1 %v347_v41 }
  0xad   :  { %976 = vmatpush3.bf16.msra.mxu1 %v1090_v62  ;;  %991 = vmatprep.mubr.msk.bf16.mxu1 %vm1110_vm1, %v1109_v63 }
  0xae   :  { %977 = vmatprep.subr.bf16.mxu1 %v1109_v63 }
  0xb1   :  { %978 = vmatpush3.bf16.msra.mxu1 %v1091_v0 }
  0xb2   :  { %979 = vmatprep.subr.bf16.mxu1 %v1109_v63 }
  0xb5   :  { %980 = vmatpush3.bf16.msra.mxu1 %v1092_v1 }
  0xb6   :  { %981 = vmatprep.subr.bf16.mxu1 %v1109_v63 }
  0xb9   :  { %982 = vmatpush3.bf16.msra.mxu1 %v1093_v2  ;;  %v1100_v2 = vld [vmem:[%s1515_s1 + $0x164] ss:$8 sps:$4 sm:$0xff]  }
  0xba   :  { %983 = vmatprep.subr.bf16.mxu1 %v1109_v63 }
  0xbd   :  { %984 = vmatpush3.bf16.msra.mxu1 %v1094_v3  ;;  %v1101_v3 = vld [vmem:[%s1515_s1 + $0x174] ss:$8 sps:$4 sm:$0xff]  }
  0xbe   :  { %985 = vmatprep.subr.bf16.mxu1 %v1109_v63 }
  0xc1   :  { %986 = vmatpush3.bf16.msra.mxu1 %v1095_v4  ;;  %v777_v4 = vpop.permute.xlu0 %776 }
  0xc2   :  { %987 = vmatprep.subr.bf16.mxu1 %v1109_v63 }
  0xc5   :  { %988 = vmatpush3.bf16.msra.mxu1 %v1096_v49 }
  0xc6   :  { %989 = vmatprep.subr.bf16.mxu1 %v1109_v63 }
  0xc9   :  { %990 = vmatpush3.bf16.msra.mxu1 %v1097_v50 }
  0xca   :  { %1007 = vmatprep.subr.bf16.mxu1 %v1109_v63 }
 0x106   :  { %v212_v58 = vpop.f32.mrb[0].mxu0 }
 0x107   :  { %v214_v59 = vpop.f32.mrb[1].mxu0  ;;  %v213_v17 = vadd.f32 %v212_v58, %v43_v15 }
 0x108   :  { %v216_v60 = vpop.f32.mrb[2].mxu0  ;;  %v215_v19 = vadd.f32 %v214_v59, %v47_v16 }
 0x109   :  { %v217_v61 = vpop.f32.mrb[3].mxu0  ;;  %v219_v26 = vmax.f32 %v213_v17, 0.0 }
 0x10a   :  { %v220_v30 = vmax.f32 %v215_v19, 0.0 }
 0x136   :  { %v326_v5 = vpop.f32.mrb[4].mxu0 }
 0x137   :  { %v328_v6 = vpop.f32.mrb[5].mxu0  ;;  %v327_v18 = vadd.f32 %v326_v5, %v43_v15  ;;  %v779_v5 = vpop.permute.xlu1 %778 }
 0x138   :  { %v330_v7 = vpop.f32.mrb[6].mxu0  ;;  %v329_v21 = vadd.f32 %v328_v6, %v47_v16  ;;  %v781_v6 = vpop.permute.xlu0 %780 }
 0x139   :  { %v331_v8 = vpop.f32.mrb[7].mxu0  ;;  %v333_v28 = vmax.f32 %v327_v18, 0.0 }
 0x13a   :  { %v334_v32 = vmax.f32 %v329_v21, 0.0 }
 0x13b   :  { %v783_v7 = vpop.permute.xlu1 %782 }
 0x13c   :  { %v785_v8 = vpop.permute.xlu0 %784 }
 0x13f   :  { %v787_v21 = vpop.permute.xlu1 %786 }
 0x14f   :  { %v271_v20 = vpop.f32.mrb[0].mxu1 }
 0x150   :  { %v272_v22 = vadd.f32 %v271_v20, %v43_v15  ;;  %v273_v23 = vpop.f32.mrb[1].mxu1 }
 0x151   :  { %v274_v24 = vadd.f32 %v273_v23, %v47_v16  ;;  %v275_v25 = vpop.f32.mrb[2].mxu1  ;;  %v791_v23 = vpop.permute.xlu1 %790 }
 0x152   :  { %v278_v27 = vmax.f32 %v272_v22, 0.0  ;;  %v276_v29 = vpop.f32.mrb[3].mxu1  ;;  %v789_v22 = vpop.permute.xlu0 %788 }
 0x153   :  { %v279_v31 = vmax.f32 %v274_v24, 0.0  ;;  %v694_v24 = vld [vmem:[%s1515_s1 + $0x1c0] sm:$0x4] }
 0x154   :  { %v280_v33 = vmax.f32 %v219_v26, %v278_v27  ;;  %v695_v25 = vunpack.c.l.bf16 %v694_v24  ;;  %v699_v26 = vsub.s32 4, %v1445_v10 }
 0x155   :  { %v281_v34 = vmax.f32 %v220_v30, %v279_v31 }
 0x156   :  { %v335_v35 = vmax.f32 %v280_v33, %v333_v28  ;;  %v700_v27 = vrot.slane %v695_v25, %v699_v26 }
 0x157   :  { %v336_v36 = vmax.f32 %v281_v34, %v334_v32 }
 0x17f   :  { %v386_v37 = vpop.f32.mrb[4].mxu1 }
 0x180   :  { %v387_v38 = vadd.f32 %v386_v37, %v43_v15  ;;  %v388_v39 = vpop.f32.mrb[5].mxu1  ;;  %v841_v37 = vand.u32 127, %v40_v9 }
 0x181   :  { %v389_v40 = vadd.f32 %v388_v39, %v47_v16  ;;  %v390_v41 = vpop.f32.mrb[6].mxu1 }
 0x182   :  { %v393_v42 = vmax.f32 %v387_v38, 0.0  ;;  %v391_v43 = vpop.f32.mrb[7].mxu1  ;;  %vm842_vm2 = vcmp.lt.s32.totalorder %v841_v37, 7  ;;  %vm857_vm3 = vcmp.eq.s32.totalorder %v841_v37, 7 }
 0x183   :  { %v394_v44 = vmax.f32 %v389_v40, 0.0 }
 0x184   :  { %v395_v45 = vmax.f32 %v335_v35, %v393_v42 }
 0x185   :  { %v396_v46 = vmax.f32 %v336_v36, %v394_v44  ;;  %v774_v36 = vsub.s32 6, %v1445_v10 }
 0x186   :  { %v431_v48 = vpack.c.bf16 %v395_v45, %v395_v45 }
 0x187   :  { %v432_v47 = vpack.c.bf16 %v396_v46, %v396_v46 }
 0x189   :  { %565 = vmatprep.mubr.bf16.mxu0 %v432_v47 }
 0x18a   :  { %566 = vmatmul.mubr.bf16.vlgmr.msra.gmra.mrb[8].mxu0 %v431_v48 }
 0x18b   :  { %1003 = vmatprep.mubr.msk.bf16.mxu0 %vm1110_vm1, %v1109_v63  ;;  %996 = vmatpush3.bf16.msra.mxu0 %v1098_v51 }
 0x18c   :  { %997 = vmatprep.subr.bf16.mxu0 %v1109_v63 }
 0x18f   :  { %998 = vmatpush3.bf16.msra.mxu0 %v1099_v52 }
 0x190   :  { %999 = vmatprep.subr.bf16.mxu0 %v1109_v63 }
 0x193   :  { %1000 = vmatpush3.bf16.msra.mxu0 %v1100_v2 }
 0x194   :  { %1001 = vmatprep.subr.bf16.mxu0 %v1109_v63 }
 0x197   :  { %1002 = vmatpush3.bf16.msra.mxu0 %v1101_v3 }
 0x25d   :  { %v946_v56 = vpop.f32.mrb[8].mxu0 }
 0x25e   :  { %v947_v58 = vpop.f32.mrb[9].mxu0 }
 0x25f   :  { %v948_v59 = vadd.f32 %v947_v58, %v946_v56  ;;  %v949_v60 = vpop.f32.mrb[10].mxu0 }
 0x260   :  { %v950_v61 = vpop.f32.mrb[11].mxu0 }
 0x261   :  { %v568_v62 = vadd.f32 %v948_v59, %v436_v57 }
 0x263   :  { %v573_v0 = vmax.f32 %v568_v62, 0.0 }
 0x265   :  { %v592_v1 = vpack.c.bf16 %v573_v0, %v573_v0 }
 0x267   :  { %992 = vmatmul.mubr.bf16.vlgmr.msra.gmra.mrb[8].mxu1 %v592_v1 }
 0x268   :  { %1023 = vmatprep.mubr.msk.bf16.mxu1 %vm1110_vm1, %v1109_v63  ;;  %1008 = vmatpush3.bf16.msra.mxu1 %v777_v4 }
 0x269   :  { %1009 = vmatprep.subr.bf16.mxu1 %v1109_v63 }
 0x26c   :  { %1010 = vmatpush3.bf16.msra.mxu1 %v779_v5 }
 0x26d   :  { %1011 = vmatprep.subr.bf16.mxu1 %v1109_v63 }
 0x270   :  { %1012 = vmatpush3.bf16.msra.mxu1 %v781_v6 }
 0x271   :  { %1013 = vmatprep.subr.bf16.mxu1 %v1109_v63 }
 0x274   :  { %1014 = vmatpush3.bf16.msra.mxu1 %v783_v7 }
 0x275   :  { %1015 = vmatprep.subr.bf16.mxu1 %v1109_v63 }
 0x278   :  { %1016 = vmatpush3.bf16.msra.mxu1 %v785_v8 }
 0x279   :  { %1017 = vmatprep.subr.bf16.mxu1 %v1109_v63 }
 0x27c   :  { %1018 = vmatpush3.bf16.msra.mxu1 %v787_v21 }
 0x27d   :  { %1019 = vmatprep.subr.bf16.mxu1 %v1109_v63 }
 0x280   :  { %1020 = vmatpush3.bf16.msra.mxu1 %v789_v22 }
 0x281   :  { %1021 = vmatprep.subr.bf16.mxu1 %v1109_v63  ;;  %v769_v63 = vld [vmem:[%s1515_s1 + $0x1c0] sm:$0x8] }
 0x282   :  { %v770_v35 = vunpack.c.l.bf16 %v769_v63 }
 0x284   :  { %1022 = vmatpush3.bf16.msra.mxu1 %v791_v23  ;;  %v775_v38 = vrot.slane %v770_v35, %v774_v36 }
 0x33a   :  { %v679_v14 = vpop.f32.mrb[8].mxu1 }
 0x33b   :  { %v680_v15 = vadd.f32 %v679_v14, %v596_v13  ;;  %v993_v16 = vpop.f32.mrb[9].mxu1 }
 0x33c   :  { %v682_v17 = vpop.f32.mrb[10].mxu1 }
 0x33d   :  { %v685_v18 = vmax.f32 %v680_v15, 0.0  ;;  %v994_v19 = vpop.f32.mrb[11].mxu1 }
 0x33f   :  { %v696_v20 = vpack.c.bf16 %v685_v18, %v685_v18 }
 0x341   :  { %1004 = vmatmul.mubr.msk.bf16.vlgmr.msra.gmra.mrb[12].mxu0 %vm174_vm0, %v696_v20 }
 0x414   :  { %v762_v28 = vpop.f32.mrb[12].mxu0 }
 0x415   :  { %v763_v29 = vadd.f32 %v762_v28, %v700_v27  ;;  %v1005_v30 = vpop.f32.mrb[13].mxu0 }
 0x416   :  { %v765_v31 = vpop.f32.mrb[14].mxu0 }
 0x417   :  { %1102 = vtanh.f32 %v763_v29  ;;  %v1006_v32 = vpop.f32.mrb[15].mxu0 }
 0x421   :  { %v1103_v33 = vpop.eup %1102 }
 0x422   :  { %v771_v34 = vpack.c.bf16 %v1103_v33, %v1103_v33 }
 0x424   :  { %1024 = vmatmul.mubr.bf16.vlgmr.msra.gmra.mrb[12].mxu1 %v771_v34 }
 0x4f7   :  { %v834_v39 = vpop.f32.mrb[12].mxu1 }
 0x4f8   :  { %v835_v40 = vadd.f32 %v834_v39, %v775_v38  ;;  %v1025_v41 = vpop.f32.mrb[13].mxu1 }
 0x4f9   :  { %v837_v42 = vpop.f32.mrb[14].mxu1 }
 0x4fa   :  { %v1026_v43 = vpop.f32.mrb[15].mxu1  ;;  %v843_v44 = vsel %vm842_vm2, %v835_v40, -3.4028235e+38  ;;  %v858_v54 = vsel %vm857_vm3, %v835_v40, 0.0 }
 0x4fb   :  { %v844_v45 = vsel %vm174_vm0, %v843_v44, -inf }
 0x4fc   :  { %845 = vmax.xlane.f32.xlu0 %v844_v45 }
 0x589   :  { %v846_v46 = vpop.xlane.xlu0 %845 }
 0x58a   :  { %v847_v47 = vsub.f32 %v843_v44, %v846_v46 }
 0x58c   :  { %v848_v48 = vmul.f32 1.442695, %v847_v47 }
 0x58e   :  { %1104 = vpow2.f32 %v848_v48 }
 0x598   :  { %v1105_v49 = vpop.eup %1104 }
 0x599   :  { %v850_v10 = vsel %vm174_vm0, %v1105_v49, 0.0 }
 0x59a   :  { %851 = vadd.xlane.f32.xlu1 %v850_v10 }
 0x627   :  { %v852_v9 = vpop.xlane.xlu1 %851 }
 0x628   :  { %1106 = vlog2.f32 %v852_v9 }
 0x632   :  { %v1107_v50 = vpop.eup %1106 }
 0x633   :  { %v854_v51 = vmul.f32 0.6931472, %v1107_v50 }
 0x635   :  { %v855_v52 = vadd.f32 %v854_v51, %v846_v46 }
 0x637   :  { %v856_v53 = vsub.f32 %v835_v40, %v855_v52 }
 0x639   :  { %v859_v55 = vsel %vm842_vm2, %v856_v53, %v858_v54 }
 0x63a   :  { %860 = vst.msk [vmem:[%s1516_s2] sm:$0xff] %vm174_vm0, %v859_v55 }

</bundles_post_ra>
